<compile_context>
chip_gen: v7x
topology: tpu7x:2x2x1
jax: 0.10.0
libtpu: 0.0.40
codegen_flags: <defaults>
</compile_context>

<pallas_src>
import functools

import jax
import jax.numpy as jnp
from jax.experimental import pallas as pl
from jax.experimental.pallas import tpu as pltpu

LANE = 128
SUBLANE = 8


def _bce_partial_kernel(pred_ref, gt_ref, out_ref, *, rows, tile_rows,
                        needs_mask):
    """Per-tile partial sum of BCE-with-logits, emitted as an (8, 128) slab."""
    i = pl.program_id(0)

    x = pred_ref[...].astype(jnp.float32)
    g = gt_ref[...].astype(jnp.float32)

    # Numerically-stable BCE-with-logits (same formulation torch uses):
    #   loss = max(x, 0) - x * g + log(1 + exp(-|x|))
    # Two EUP transcendentals / element (kept in f32 for all generations).
    loss = jnp.maximum(x, 0.0) - x * g + jnp.log(1.0 + jnp.exp(-jnp.abs(x)))

    def _partial(vals):
        # (tile_rows, 128) -> (8, 128): pure vreg-wise VPU adds (no cross-
        # sublane XLU reduce) and a full, aligned-vreg output store.
        return jnp.sum(vals.reshape(-1, SUBLANE, LANE), axis=0)

    if needs_mask:
        last = pl.num_programs(0) - 1

        @pl.when(i == last)
        def _():
            # The last block overhangs the (rows, 128) array; overhang rows
            # hold unspecified data whose exp/log may be Inf/NaN.  jnp.where
            # (a select) discards them -- do NOT refactor this into a
            # multiply-by-mask, which would propagate NaN.
            valid = rows - i * tile_rows                       # scalar rows left
            row = jax.lax.broadcasted_iota(jnp.int32, loss.shape, 0)
            out_ref[...] = _partial(jnp.where(row < valid, loss, 0.0))

        @pl.when(i != last)
        def _():
            out_ref[...] = _partial(loss)
    else:
        out_ref[...] = _partial(loss)


def _bce_elementwise(x, g):
    x = x.astype(jnp.float32)
    g = g.astype(jnp.float32)
    return jnp.maximum(x, 0.0) - x * g + jnp.log(1.0 + jnp.exp(-jnp.abs(x)))


def visual_hint_loss_balanced_all(pred, gt, *, tile_rows=4096):
    """Exact forward of VisualHintLossBalancedALL: mean BCE-with-logits."""
    assert pred.shape == gt.shape
    n = int(pred.size)
    if n == 0:
        return jnp.float32(0.0)

    # Lane-dense main slab + tiny wrapper-side tail (no jnp.pad full copy).
    # TODO(synk): for NCHW inputs with tiny trailing dims (e.g. 16x16) the
    # flatten itself is a relayout copy; fusing it into the producing op (or a
    # BlockSpec over the original layout) would remove that extra HBM pass.
    pred_f = jnp.reshape(pred, (-1,))
    gt_f = jnp.reshape(gt, (-1,))
    rem = n % LANE
    n_main = n - rem

    if rem:
        tail_sum = jnp.sum(_bce_elementwise(pred_f[n_main:], gt_f[n_main:]))
    else:
        tail_sum = jnp.float32(0.0)

    if n_main == 0:          # fewer than 128 elements: wrapper handles it all
        return tail_sum / n

    rows = n_main // LANE
    pred_2d = jnp.reshape(pred_f[:n_main] if rem else pred_f, (rows, LANE))
    gt_2d = jnp.reshape(gt_f[:n_main] if rem else gt_f, (rows, LANE))

    # --- Tile-size selection -------------------------------------------------
    # Sub-32-bit inputs need a larger sublane multiple (16 for bf16, 32 for i8).
    itemsize = min(jnp.dtype(pred.dtype).itemsize, jnp.dtype(gt.dtype).itemsize)
    row_align = SUBLANE * max(1, 4 // max(1, itemsize))

    tile_rows = max(row_align, int(tile_rows) - int(tile_rows) % row_align)
    max_rows = pl.cdiv(rows, row_align) * row_align
    tile_rows = min(tile_rows, max_rows)       # never grossly exceed the data
    # Keep >= 2 grid steps when possible: the grid axis is "parallel", so
    # v7x's two TensorCores both get work instead of one idling.
    if rows > row_align and pl.cdiv(rows, tile_rows) < 2:
        tile_rows = pl.cdiv(pl.cdiv(rows, 2), row_align) * row_align

    num_tiles = pl.cdiv(rows, tile_rows)
    needs_mask = num_tiles * tile_rows != rows      # last-block row overhang

    tile_spec = pl.BlockSpec((tile_rows, LANE), lambda i: (i, 0))

    # VMEM budget: 2 inputs x 2 pipeline buffers x (<=2 MiB f32 block at
    # tile_rows=4096) = <=8 MiB plus f32 temps.  48 MiB lifts the 16/32 MiB
    # scoped defaults and still fits v7x's 64 MiB-per-TC physical VMEM.
    vmem_limit = 48 * 1024 * 1024

    partials = pl.pallas_call(
        functools.partial(_bce_partial_kernel, rows=rows,
                          tile_rows=tile_rows, needs_mask=needs_mask),
        out_shape=jax.ShapeDtypeStruct((num_tiles * SUBLANE, LANE),
                                       jnp.float32),
        grid_spec=pltpu.PrefetchScalarGridSpec(
            num_scalar_prefetch=0,
            grid=(num_tiles,),
            in_specs=[tile_spec, tile_spec],
            out_specs=pl.BlockSpec((SUBLANE, LANE), lambda i: (i, 0)),
        ),
        compiler_params=pltpu.CompilerParams(
            dimension_semantics=("parallel",),
            vmem_limit_bytes=vmem_limit),
    )(pred_2d, gt_2d)

    # Tiny cross-tile reduction + mean in the wrapper.
    return (jnp.sum(partials) + tail_sum) / n


def _reference(pred, gt):
    x = pred.astype(jnp.float32)
    g = gt.astype(jnp.float32)
    loss = jnp.maximum(x, 0.0) - x * g + jnp.log(1.0 + jnp.exp(-jnp.abs(x)))
    return jnp.mean(loss)


if __name__ == "__main__":
    key = jax.random.PRNGKey(0)
    k1, k2, k3, k4, k5, k6 = jax.random.split(key, 6)

    # Case 1: NCHW like the PyTorch module, binary hint map (numel % 128 == 0).
    pred = jax.random.normal(k1, (2, 4, 16, 16), dtype=jnp.float32)
    gt = (jax.random.uniform(k2, (2, 4, 16, 16)) > 0.5).astype(jnp.float32)
    loss = jax.block_until_ready(visual_hint_loss_balanced_all(pred, gt))
    ref = _reference(pred, gt)
    assert jnp.allclose(loss, ref, rtol=1e-4, atol=1e-5), (loss, ref)

    # Case 2: ragged numel (exercises in-kernel row mask + wrapper tail) and
    # soft targets.
    pred2 = jax.random.normal(k3, (2, 3, 15, 17), dtype=jnp.float32)
    gt2 = jax.random.uniform(k4, (2, 3, 15, 17), dtype=jnp.float32)
    loss2 = jax.block_until_ready(visual_hint_loss_balanced_all(pred2, gt2))
    ref2 = _reference(pred2, gt2)
    assert jnp.allclose(loss2, ref2, rtol=1e-4, atol=1e-5), (loss2, ref2)

    # Case 3: bf16 inputs passed straight through (halved HBM bytes),
    # multi-tile path with larger blocks.
    pred3 = jax.random.normal(k5, (2, 8, 128, 128), dtype=jnp.bfloat16)
    gt3 = (jax.random.uniform(k6, (2, 8, 128, 128)) > 0.5).astype(jnp.bfloat16)
    loss3 = jax.block_until_ready(visual_hint_loss_balanced_all(pred3, gt3))
    ref3 = _reference(pred3, gt3)
    assert jnp.allclose(loss3, ref3, rtol=1e-3, atol=1e-4), (loss3, ref3)

    print("KERNEL_OK")
</pallas_src>

<mosaic_0001>
module attributes {stable_mosaic.version = 11 : i64} {
  func.func @_bce_partial_kernel(%arg0: i32, %arg1: memref<8x128xf32, #tpu.memory_space<vmem>>, %arg2: memref<8x128xf32, #tpu.memory_space<vmem>>, %arg3: memref<8x128xf32, #tpu.memory_space<vmem>>) attributes {dimension_semantics = [#tpu.dimension_semantics<parallel>], iteration_bounds = array<i64: 2>, scalar_prefetch = 0 : i64, scratch_operands = 0 : i64, tpu.core_type = #tpu.core_type<tc>, window_params = [{transform_indices = @transform_0, window_bounds = array<i64: 8, 128>}, {transform_indices = @transform_1, window_bounds = array<i64: 8, 128>}, {transform_indices = @transform_2, window_bounds = array<i64: 8, 128>}]} {
    %c0 = arith.constant 0 : index
    %c0_0 = arith.constant 0 : index
    %0 = vector.load %arg1[%c0, %c0_0] : memref<8x128xf32, #tpu.memory_space<vmem>>, vector<8x128xf32>
    %c0_1 = arith.constant 0 : index
    %c0_2 = arith.constant 0 : index
    %1 = vector.load %arg2[%c0_1, %c0_2] : memref<8x128xf32, #tpu.memory_space<vmem>>, vector<8x128xf32>
    %cst = arith.constant 0.000000e+00 : f32
    %2 = vector.broadcast %cst : f32 to vector<8x128xf32>
    %3 = arith.maximumf %0, %2 : vector<8x128xf32>
    %4 = arith.mulf %0, %1 : vector<8x128xf32>
    %5 = arith.subf %3, %4 : vector<8x128xf32>
    %6 = math.absf %0 : vector<8x128xf32>
    %cst_3 = arith.constant 0.000000e+00 : f32
    %7 = vector.broadcast %cst_3 : f32 to vector<8x128xf32>
    %8 = arith.subf %7, %6 : vector<8x128xf32>
    %9 = math.exp %8 : vector<8x128xf32>
    %cst_4 = arith.constant 1.000000e+00 : f32
    %10 = vector.broadcast %cst_4 : f32 to vector<8x128xf32>
    %11 = arith.addf %10, %9 : vector<8x128xf32>
    %12 = math.log %11 : vector<8x128xf32>
    %13 = arith.addf %5, %12 : vector<8x128xf32>
    %14 = vector.shape_cast %13 : vector<8x128xf32> to vector<1x8x128xf32>
    %cst_5 = arith.constant dense<0.000000e+00> : vector<8x128xf32>
    %15 = vector.multi_reduction <add>, %14, %cst_5 [0] : vector<1x8x128xf32> to vector<8x128xf32>
    %c0_6 = arith.constant 0 : index
    %c0_7 = arith.constant 0 : index
    %16 = vector.load %arg3[%c0_6, %c0_7] : memref<8x128xf32, #tpu.memory_space<vmem>>, vector<8x128xf32>
    tpu.vector_store %arg3[%c0_6, %c0_7], %15 {strides = array<i32>} : memref<8x128xf32, #tpu.memory_space<vmem>>, vector<8x128xf32>,
    return
  }
  func.func @transform_0(%arg0: i32) -> (i32, i32) {
    %c0_i32 = arith.constant 0 : i32
    %c0_i32_0 = arith.constant 0 : i32
    return %arg0, %c0_i32 : i32, i32
  }
  func.func @transform_1(%arg0: i32) -> (i32, i32) {
    %c0_i32 = arith.constant 0 : i32
    %c0_i32_0 = arith.constant 0 : i32
    return %arg0, %c0_i32 : i32, i32
  }
  func.func @transform_2(%arg0: i32) -> (i32, i32) {
    %c0_i32 = arith.constant 0 : i32
    %c0_i32_0 = arith.constant 0 : i32
    return %arg0, %c0_i32 : i32, i32
  }
}

</mosaic_0001>

<bundles_post_ra>
// kernel: tpu_custom_call.1
= control target key start
LH: loop header
LB: loop body
LE: loop exit
PB: predicated region body
PF: predicated region fallthrough
CT: control target
= control target key end

     0   :  { %7 = vsyncpa [#allocation3], 0  ;;  %s752_s0 = inlined_call_operand.hbm [shape: f32[16,128], index: 0, kind: input, shape index: {}]   ;;  %s753_s1 = inlined_call_operand.hbm [shape: f32[16,128], index: 1, kind: input, shape index: {}]   ;;  %s754_s2 = inlined_call_operand.hbm [shape: f32[16,128], index: 2, kind: output, shape index: {}]  }
   0x1   :  { %9 = vsyncpa [#allocation3 + $0x1], 0 }
   0x2   :  { %10 = vsyncpa [#allocation6], 0 }
   0x3   :  { %12 = vsyncpa [#allocation6 + $0x1], 0 }
   0x4   :  { %13 = vsyncpa [#allocation4], 0 }
   0x5   :  { %15 = vsyncpa [#allocation4 + $0x1], 0  ;;  %s538_s9 = smov 0   ;;  %s540_s10 = smov 0  }
   0x6   :  { %s542_s11 = smov 0   ;;  %s544_s12 = smov 0  }
   0x7 LB: > { %s559_s13 = sadd.s32 4294967295, %s518_s12   ;;  %s318_s14 = sadd.s32 4294967294, %s518_s12   ;;  %s518_s12 = sphi %s544_s12, %s773_s12   ;;  %s514_s11 = sphi %s542_s11, %s772_s11   ;;  %s510_s10 = sphi %s540_s10, %s771_s10   ;;  %s506_s9 = sphi %s538_s9, %s770_s9  }
   0x8   : > { %s563_s15 = sadd.s32 1, %s518_s12   ;;  %s28_s16 = sadd.s32 1, %s514_s11 }
   0x9   : > { %s25_s17 = ssub.s32 %s518_s12, %s563_s15  ;;  %p35_p0 = scmp.ne.s32.totalorder %s514_s11, %s510_s10 }
   0xa   : > { %p26_p1 = scmp.eq.s32.totalorder %s25_s17, 0  ;;  %p36_p2 = scmp.eq.s32.totalorder %s518_s12, 0 }
   0xb   : > { %p41_p3 = scmp.ne.s32.totalorder %s510_s10, %s506_s9  ;;  %p42_p4 = scmp.eq.s32.totalorder %s559_s13, 0 }
   0xc   : > { %s575_s18 = scalar_select %p26_p1, %s514_s11, %s28_s16  }
   0xd   : > { %p577_p5 = por %p36_p2, %p35_p0  ;;  %p581_p6 = por %p42_p4, %p41_p3 }
   0xe   : > { %p91_p7 = scmp.eq.s32.totalorder %s559_s13, 1  ;;  %p97_p8 = scmp.eq.s32.totalorder %s318_s14, 1 }
   0xf   : > { %s758_s20 = scalar_select %p581_p6, 1, 0 }
  0x10   : > { %p350_p10 = scmp.lt.s32.totalorder %s518_s12, 2  ;;  %p588_p11 = por %p91_p7, %p35_p0 }
  0x11   : > { %p592_p12 = por %p97_p8, %p41_p3  ;;  %s597_s23 = sand.u32 1, %s514_s11  }
  0x12   : > { %s759_s21 = scalar_select %p588_p11, 1, 0 }
  0x13   : > { %s760_s22 = scalar_select %p592_p12, 1, 0 }
  0x14   : > { %s322_s24 = sshll.u32 %s518_s12, 7  ;;  %s321_s25 = sshll.u32 %s597_s23, 3 }
  0x15   : > { %s606_s28 = scalar_lea.hbm %s752_s0, %s322_s24  ;;  %s121_s29 = scalar_lea.vmem [#allocation2], %s321_s25 }
  0x16   : > { %s128_s30 = sshll.u32 %s121_s29, 4  ;;  %p612_p13 = pnand %p350_p10, %p577_p5  ;;  %s616_s30 = int_to_ptr.vmem [resolvable:$true] %s128_s30 }
  0x17   : > { %s118_s4 = scalar_lea.sflag [#allocation3], %s597_s23  ;;  %s388_s5 = scalar_lea.hbm %s606_s28, 128 }
  0x18   : > { %p389_p2 = scmp.ne.s32.totalorder %s606_s28, %s388_s5  ;;  %p390_p3 = pneg %p612_p13 }
  0x19   : > { %s393_s8 = scalar_lea.hbm %s752_s0, 256  ;;  %p394_p5 = scmp.lt.u32.totalorder %s606_s28, %s752_s0 }
  0x1a   : > { %p391_p4 = pnand %p390_p3, %p389_p2  ;;  %p395_p8 = scmp.lt.u32.totalorder %s393_s8, %s388_s5 }
  0x1b   : > { %p397_p9 = scmp.lt.u32.totalorder %s388_s5, %s606_s28 }
  0x1c   : > { %p392_p7 = pneg %p391_p4  ;;  %p396_p10 = por %p395_p8, %p394_p5 }
  0x1e   : > { %p398_p0 = por %p397_p9, %p396_p10 }
  0x20   : > { %p399_p1 = pnand %p398_p0, %p392_p7 }
  0x22   : > { %402 = shalt.err (!%p399_p1)
}
  0x23   : > { %s403_s17 = scalar_lea.vmem %s616_s30, 128  ;;  %s520_s19 = smov [#allocation2]  }
  0x24   : > { %p404_p2 = scmp.ne.s32.totalorder %s616_s30, %s403_s17  ;;  %s408_s26 = sshll.u32 %s520_s19, 4  ;;  %s409_s26 = int_to_ptr.vmem [resolvable:$false] %s408_s26 }
  0x25   : > { %s410_s27 = scalar_lea.vmem %s409_s26, 256  ;;  %p411_p11 = scmp.lt.s32.totalorder %s616_s30, %s409_s26 }
  0x26   : > { %p406_p4 = pnand %p404_p2, %p390_p3  ;;  %p412_p5 = scmp.lt.s32.totalorder %s410_s27, %s403_s17 }
  0x28   : > { %p407_p12 = pneg %p406_p4  ;;  %p413_p8 = por %p412_p5, %p411_p11 }
  0x2a   : > { %p414_p9 = pnand %p413_p8, %p407_p12 }
  0x2c   : > { %417 = shalt.err (!%p414_p9)
}
  0x2d   : > { %342 = dma.hbm_to_vmem [thread:$0]  (!%p612_p13), %s606_s28, 128, %s616_s30, %s118_s4  }
  0x2e   : > { %p762_p0 = scmp.lt.s32.totalorder %s518_s12, 3  ;;  %p763_p1 = scmp.ge.s32.totalorder %s518_s12, 1 }
  0x2f   : > { %s659_s7 = scalar_lea.hbm %s753_s1, %s322_s24  ;;  %s139_s8 = scalar_lea.vmem [#allocation5], %s321_s25 }
  0x30   : > { %p650_p7 = pnand %p763_p1, %p762_p0  ;;  %s146_s14 = sshll.u32 %s139_s8, 4  ;;  %s147_s14 = int_to_ptr.vmem [resolvable:$true] %s146_s14 }
  0x31   : > { %s136_s28 = scalar_lea.sflag [#allocation6], %s597_s23  ;;  %s418_s30 = scalar_lea.hbm %s659_s7, 128 }
  0x32   : > { %s764_s29 = scalar_select %p650_p7, 1, 0 }
  0x33   : > { %p419_p11 = scmp.ne.s32.totalorder %s659_s7, %s418_s30  ;;  %s423_s24 = scalar_lea.hbm %s753_s1, 256 }
  0x34   : > { %p424_p2 = scmp.lt.u32.totalorder %s659_s7, %s753_s1  ;;  %p425_p4 = scmp.lt.u32.totalorder %s423_s24, %s418_s30 }
  0x35   : > { %p421_p12 = pnand %p419_p11, %p390_p3  ;;  %p427_p8 = scmp.lt.u32.totalorder %s418_s30, %s659_s7 }
  0x36   : > { %p426_p5 = por %p425_p4, %p424_p2 }
  0x37   : > { %p422_p10 = pneg %p421_p12 }
  0x38   : > { %p428_p9 = por %p427_p8, %p426_p5 }
  0x3a   : > { %p429_p0 = pnand %p428_p9, %p422_p10 }
  0x3c   : > { %432 = shalt.err (!%p429_p0)
}
  0x3d   : > { %s433_s23 = scalar_lea.vmem %s147_s14, 128  ;;  %s521_s25 = smov [#allocation5]  }
  0x3e   : > { %p434_p1 = scmp.ne.s32.totalorder %s147_s14, %s433_s23  ;;  %s438_s26 = sshll.u32 %s521_s25, 4  ;;  %s439_s26 = int_to_ptr.vmem [resolvable:$false] %s438_s26 }
  0x3f   : > { %s440_s27 = scalar_lea.vmem %s439_s26, 256  ;;  %p441_p6 = scmp.lt.s32.totalorder %s147_s14, %s439_s26 }
  0x40   : > { %p436_p11 = pnand %p434_p1, %p390_p3  ;;  %p442_p7 = scmp.lt.s32.totalorder %s440_s27, %s433_s23 }
  0x42   : > { %p437_p12 = pneg %p436_p11  ;;  %p443_p2 = por %p442_p7, %p441_p6 }
  0x44   : > { %p444_p4 = pnand %p443_p2, %p437_p12 }
  0x46   : > { %447 = shalt.err (!%p444_p4)
}
  0x47   : > { %345 = dma.hbm_to_vmem [thread:$0]  (!%p612_p13), %s659_s7, 128, %s147_s14, %s136_s28  }
  0x48   : > { %p765_p10 = scmp.ne.s32.totalorder %s764_s29, 0 }
  0x49   : > { %s686_s5 = sand.u32 (!%p765_p10), 1, %s510_s10   ;;  %p766_p6 = scmp.ne.s32.totalorder (!%p765_p10), %s758_s20, 0 }
  0x4a   : > { %155 = sbr.rel (%p765_p10) target bundleno = 133 (0x85), region = 28  ;;  %s689_s6 = sshll.u32 (!%p765_p10), %s686_s5, 3 }
  0x4b   : > { %s158_s8 = scalar_lea.sflag (!%p765_p10), [#allocation3], %s686_s5  ;;  %s161_s30 = scalar_lea.vmem (!%p765_p10), [#allocation2], %s689_s6 }
  0x51   : > { %493 = dma.done.wait (%p766_p6), %s158_s8, 128  }
  0x52   : > { %495 = vsyncadd (%p766_p6), %s158_s8, 4294967168  ;;  %s167_s3 = scalar_lea.sflag [#allocation6], %s686_s5  ;;  %s170_s29 = scalar_lea.vmem [#allocation5], %s689_s6 }
  0x53   : > { %497 = dma.done.wait (%p766_p6), %s167_s3, 128  }
  0x54   : > { %499 = vsyncadd (%p766_p6), %s167_s3, 4294967168  ;;  %v196_v0 = vld [vmem:[%s161_s30] sm:$0xff]  ;;  %v197_v6 = vld [vmem:[%s170_s29] sm:$0xff]  ;;  %s195_s7 = scalar_lea.vmem [#allocation7], %s689_s6  ;;  %s330_s14 = sshll.u32 %s559_s13, 7 }
  0x55   : > { %v201_v1 = vand.u32 2147483647, %v196_v0  ;;  %v198_v7 = vmax.f32 %v196_v0, 0.0  ;;  %v199_v8 = vmul.f32 %v197_v6, %v196_v0  ;;  %s225_s20 = sshll.u32 %s195_s7, 4  ;;  %s710_s16 = scalar_lea.hbm %s754_s2, %s330_s14  ;;  %s705_s20 = int_to_ptr.vmem [resolvable:$true] %s225_s20 }
  0x56   : > { %s212_s24 = scalar_lea.sflag [#allocation4], %s686_s5  ;;  %s448_s17 = scalar_lea.vmem %s705_s20, 128 }
  0x57   : > { %v202_v2 = vsub.f32 0.0, %v201_v1  ;;  %v200_v9 = vsub.f32 %v198_v7, %v199_v8  ;;  %p449_p13 = scmp.ne.s32.totalorder %s705_s20, %s448_s17  ;;  %p767_p3 = scmp.ne.s32.totalorder %s759_s21, 0 }
  0x58   : > { %s522_s13 = smov [#allocation7]  }
  0x59   : > { %v203_v3 = vmul.f32 1.442695, %v202_v2  ;;  %p450_p7 = pnand %p449_p13, %p767_p3  ;;  %s452_s19 = sshll.u32 %s522_s13, 4  ;;  %s453_s19 = int_to_ptr.vmem [resolvable:$false] %s452_s19 }
  0x5a   : > { %s454_s23 = scalar_lea.vmem %s453_s19, 256  ;;  %p455_p8 = scmp.lt.s32.totalorder %s705_s20, %s453_s19 }
  0x5b   : > { %384 = vpow2.f32 %v203_v3  ;;  %p451_p5 = pneg %p450_p7  ;;  %p456_p9 = scmp.lt.s32.totalorder %s454_s23, %s448_s17 }
  0x5d   : > { %p457_p0 = por %p456_p9, %p455_p8 }
  0x5f   : > { %p458_p1 = pnand %p457_p0, %p451_p5 }
  0x65   : > { %v385_v4 = vpop.eup %384 }
  0x66   : > { %v205_v5 = vadd.f32 1.0, %v385_v4 }
  0x68   : > { %386 = vlog2.f32 %v205_v5 }
  0x72   : > { %v387_v10 = vpop.eup %386 }
  0x73   : > { %v207_v11 = vmul.f32 0.6931472, %v387_v10 }
  0x75   : > { %v208_v12 = vadd.f32 %v207_v11, %v200_v9 }
  0x77   : > { %210 = vst [vmem:[%s195_s7] sm:$0xff] %v208_v12 }
  0x78   : > { %461 = shalt.err (!%p458_p1)
}
  0x79   : > { %s462_s25 = scalar_lea.hbm %s710_s16, 128  ;;  %s466_s5 = scalar_lea.hbm %s754_s2, 256 }
  0x7a   : > { %p463_p11 = scmp.ne.s32.totalorder %s710_s16, %s462_s25  ;;  %p467_p4 = scmp.lt.u32.totalorder %s710_s16, %s754_s2 }
  0x7b   : > { %p468_p10 = scmp.lt.u32.totalorder %s466_s5, %s462_s25  ;;  %p470_p13 = scmp.lt.u32.totalorder %s462_s25, %s710_s16 }
  0x7c   : > { %p464_p12 = pnand %p463_p11, %p767_p3 }
  0x7d   : > { %p469_p6 = por %p468_p10, %p467_p4 }
  0x7e   : > { %p465_p2 = pneg %p464_p12 }
  0x7f   : > { %p471_p7 = por %p470_p13, %p469_p6 }
  0x81   : > { %p472_p5 = pnand %p471_p7, %p465_p2 }
  0x83   : > { %475 = shalt.err (!%p472_p5)
}
  0x84   : > { %337 = dma.vmem_to_hbm [thread:$0]  (%p767_p3), %s705_s20, 128, %s710_s16, %s212_s24  }
  0x85 PF: > { %s237_s30 = sand.u32 1, %s506_s9   ;;  %p768_p8 = scmp.ne.s32.totalorder %s760_s22, 0 }
  0x86   : > { %p769_p9 = scmp.ge.s32.totalorder %s518_s12, 2  ;;  %s238_s3 = scalar_lea.sflag [#allocation4], %s237_s30 }
  0x88   : > { %p347_p0 = pnand %p769_p9, %p768_p8 }
  0x8a   : > { %501 = dma.done.wait (!%p347_p0), %s238_s3, 128  }
  0x8b   : > { %503 = vsyncadd (!%p347_p0), %s238_s3, 4294967168  ;;  %p18_p1 = scmp.ge.s32.totalorder %s563_s15, 4   ;;  %s770_s9 = smov %s510_s10 }
  0x8c   : > { %s771_s10 = smov %s514_s11  ;;  %s772_s11 = smov %s575_s18 }
  0x8d   : > { %s773_s12 = smov %s563_s15  ;;  %20 = sbr.rel (!%p18_p1) target bundleno = 7 (0x7), region = 86 }
  0x94   :  { %243 = vsyncpa [#allocation3], 1 }
  0x95   :  { %245 = vsyncpa [#allocation3 + $0x1], 1 }
  0x96   :  { %246 = vsyncpa [#allocation6], 1 }
  0x97   :  { %248 = vsyncpa [#allocation6 + $0x1], 1 }
  0x98   :  { %249 = vsyncpa [#allocation4], 1 }
  0x99   :  { %251 = vsyncpa [#allocation4 + $0x1], 1 }

</bundles_post_ra>
